<compile_context>
chip_gen: v7x
topology: tpu7x:2x2x1
jax: 0.10.0
libtpu: 0.0.40
codegen_flags: <defaults>
</compile_context>

<pallas_src>
import jax
import jax.numpy as jnp
from jax.experimental import pallas as pl
from jax.experimental.pallas import tpu as pltpu


def _round_up(x, m):
    return (x + m - 1) // m * m


def _reverse_kernel_sampling_kernel(z_ref, a_ref,
                                    w1_ref, b1_ref,
                                    w2_ref, b2_ref,
                                    w3_ref, b3_ref,
                                    out_ref):
    """One batch tile: 3 MXU matmuls + fused log-sigmoid + lane reduce."""
    cdt = w1_ref.dtype                       # MXU operand dtype (f32 or bf16)
    z = z_ref[...]                           # [bm, z_dim], streamed as f32
    if z.dtype != cdt:                       # in-kernel cast: no extra HBM pass
        z = z.astype(cdt)

    h0 = jnp.dot(z, w1_ref[...],
                 preferred_element_type=jnp.float32) + b1_ref[...]
    h0 = jnp.maximum(h0, 0.0)                                   # relu (f32 VPU)

    h1 = jnp.dot(h0.astype(cdt), w2_ref[...],
                 preferred_element_type=jnp.float32) + b2_ref[...]
    h1 = jnp.maximum(h1, 0.0)                                   # relu (f32 VPU)

    logits = jnp.dot(h1.astype(cdt), w3_ref[...],
                     preferred_element_type=jnp.float32) + b3_ref[...]

    # Fuse sigmoid -> where(a == 1) -> log into one numerically stable
    # log-sigmoid:  log(p) if a==1 else log(1-p)  ==  log_sigmoid((2a-1)*logits).
    # NOTE: equivalence requires `a` to be exactly {0., 1.} (same contract as the
    # torch.where in the reference module). One exp + one log on the EUP, no VPU
    # select, no log(0) = -inf hazard when the sigmoid saturates.
    sign = 2.0 * a_ref[...] - 1.0            # exact +/-1 in f32
    t = sign * logits
    log_probs = jnp.minimum(t, 0.0) - jnp.log(1.0 + jnp.exp(-jnp.abs(t)))

    # Lane-dense [1, bm] writeback (unmasked vst). The [bm] -> [1, bm] relayout
    # after the lane reduce is an XLU move that hides under the MXU slot at
    # these sizes (verified acceptable; revisit with a bundle dump if bm >> 2048).
    out_ref[...] = jnp.sum(log_probs, axis=1)[None, :]


def reverse_kernel_sampling(z_fin, a, params, *, block_b=1024,
                            compute_dtype=jnp.float32):
    """Pallas implementation of Reverse_kernel_sampling.forward.

    - z/a are streamed to the kernel in their native f32 layout (no wrapper-side
      cast or pad passes over HBM); weights/biases are tiny and stay resident in
      VMEM across the whole grid (constant index_map).
    - Batch tiling: a single full-dim tile for B <= 128; otherwise a multiple of
      128 capped at `block_b` and sized so the grid has >= 2 "parallel" steps
      (shards across both TensorCores on v7x). Ragged last tile is masked by
      Pallas (no host-side padding).
    - `compute_dtype=jnp.bfloat16` opts into bf16 MXU operands with f32
      accumulation; all elementwise math stays f32.
    """
    w1, b1, w2, b2, w3, b3 = params
    B, z_dim = z_fin.shape
    H = w1.shape[1]                      # 5 * K
    K = w3.shape[1]

    cdt = jnp.dtype(compute_dtype)
    # Weight casts are tiny (few KB) and amortized over the whole batch.
    w1_c, w2_c, w3_c = (w.astype(cdt) for w in (w1, w2, w3))
    b1_c, b2_c, b3_c = (b.astype(jnp.float32).reshape(1, -1)
                        for b in (b1, b2, b3))

    z_in = z_fin.astype(jnp.float32)     # no-op for f32 inputs (no extra pass)
    a_in = a.astype(jnp.float32)

    # Batch tile: full-dim block for tiny batches, else multiple of 128 with
    # >= 2 grid steps so the parallel axis can use both TCs (v7x megacore).
    if B <= 128:
        bm = B
    else:
        bm = min(_round_up(block_b, 128), _round_up(pl.cdiv(B, 2), 128))
    grid = (pl.cdiv(B, bm),)             # ragged tail handled by Pallas masking

    cost = pl.CostEstimate(
        flops=2 * B * (z_dim * H + H * H + H * K),
        transcendentals=2 * B * K,                    # exp + log per element
        bytes_accessed=(z_in.size + a_in.size + B) * 4
        + sum(x.size * x.dtype.itemsize
              for x in (w1_c, b1_c, w2_c, b2_c, w3_c, b3_c)))

    compiler_params = pltpu.CompilerParams(
        dimension_semantics=("parallel",),
        # Only needed for very large tiles: f32 lane-padded intermediates are
        # ~bm*512 B each, so the default scoped VMEM (16 MiB on v5e) is fine
        # for the default bm <= 2048.
        vmem_limit_bytes=(48 * 1024 * 1024 if bm >= 4096 else None),
    )

    out = pl.pallas_call(
        _reverse_kernel_sampling_kernel,
        out_shape=jax.ShapeDtypeStruct((1, B), jnp.float32),
        grid_spec=pltpu.PrefetchScalarGridSpec(
            num_scalar_prefetch=0,
            grid=grid,
            in_specs=[
                pl.BlockSpec((bm, z_dim), lambda i: (i, 0)),   # z tile (streamed)
                pl.BlockSpec((bm, K),     lambda i: (i, 0)),   # a tile (streamed)
                pl.BlockSpec((z_dim, H),  lambda i: (0, 0)),   # W1 (resident)
                pl.BlockSpec((1, H),      lambda i: (0, 0)),   # b1
                pl.BlockSpec((H, H),      lambda i: (0, 0)),   # W2
                pl.BlockSpec((1, H),      lambda i: (0, 0)),   # b2
                pl.BlockSpec((H, K),      lambda i: (0, 0)),   # W3
                pl.BlockSpec((1, K),      lambda i: (0, 0)),   # b3
            ],
            out_specs=pl.BlockSpec((1, bm), lambda i: (0, i)),  # lane-dense
        ),
        compiler_params=compiler_params,
        cost_estimate=cost,
    )(z_in, a_in, w1_c, b1_c, w2_c, b2_c, w3_c, b3_c)

    return out[0]                        # [B], matches torch.sum(..., dim=1)


def init_params(key, z_dim, K):
    """Deterministic synthetic parameters (shapes match the nn.Module)."""
    H = 5 * K
    k1, k2, k3, k4, k5, k6 = jax.random.split(key, 6)
    # stored as [in, out]; equivalent to torch Linear weight.T
    w1 = jax.random.normal(k1, (z_dim, H), jnp.float32) * 0.1
    b1 = jax.random.normal(k2, (1, H), jnp.float32) * 0.1
    w2 = jax.random.normal(k3, (H, H), jnp.float32) * 0.1
    b2 = jax.random.normal(k4, (1, H), jnp.float32) * 0.1
    w3 = jax.random.normal(k5, (H, K), jnp.float32) * 0.1
    b3 = jax.random.normal(k6, (1, K), jnp.float32) * 0.1
    return (w1, b1, w2, b2, w3, b3)


def _reference(z_fin, a, params):
    """Pure-JAX mirror of the PyTorch forward (sigmoid -> where -> log -> sum)."""
    w1, b1, w2, b2, w3, b3 = params
    h0 = jax.nn.relu(z_fin @ w1 + b1)
    h1 = jax.nn.relu(h0 @ w2 + b2)
    probs = jax.nn.sigmoid(h1 @ w3 + b3)
    probs = jnp.where(a == 1.0, probs, 1.0 - probs)
    return jnp.sum(jnp.log(probs), axis=1)


if __name__ == "__main__":
    B, z_dim, K = 8, 32, 8               # small shapes consistent with the module
    key = jax.random.PRNGKey(0)
    kz, ka, kz2, ka2, kp = jax.random.split(key, 5)

    z_fin = jax.random.normal(kz, (B, z_dim), jnp.float32)
    a = jax.random.bernoulli(ka, 0.5, (B, K)).astype(jnp.float32)
    params = init_params(kp, z_dim, K)
    ref = _reference(z_fin, a, params)

    # Default path: f32 end-to-end, single full-dim tile. Tight tolerance.
    out = jax.block_until_ready(reverse_kernel_sampling(z_fin, a, params))
    assert out.shape == (B,)
    assert jnp.allclose(out, ref, atol=1e-5, rtol=1e-5)

    # Opt-in bf16 MXU operands (weights cast in wrapper, z cast in-kernel).
    out_bf16 = jax.block_until_ready(
        reverse_kernel_sampling(z_fin, a, params, compute_dtype=jnp.bfloat16))
    assert out_bf16.shape == (B,)
    assert jnp.allclose(out_bf16, ref, atol=5e-2, rtol=5e-2)

    # Larger, non-divisible batch: multi-step pipelined grid (>= 2 parallel
    # steps for v7x megacore) with a ragged, Pallas-masked last tile and no
    # host-side padding.
    B2 = 300
    z2 = jax.random.normal(kz2, (B2, z_dim), jnp.float32)
    a2 = jax.random.bernoulli(ka2, 0.5, (B2, K)).astype(jnp.float32)
    ref2 = _reference(z2, a2, params)

    out2 = jax.block_until_ready(reverse_kernel_sampling(z2, a2, params))
    assert out2.shape == (B2,)
    assert jnp.allclose(out2, ref2, atol=1e-5, rtol=1e-5)

    # Force a smaller tile to exercise a 3-step grid with the ragged tail.
    out2_small = jax.block_until_ready(
        reverse_kernel_sampling(z2, a2, params, block_b=128))
    assert jnp.allclose(out2_small, ref2, atol=1e-5, rtol=1e-5)

    print("KERNEL_OK")
</pallas_src>

<mosaic_0001>
module attributes {stable_mosaic.version = 11 : i64} {
  func.func @_reverse_kernel_sampling_kernel(%arg0: i32, %arg1: memref<8x32xf32, #tpu.memory_space<vmem>>, %arg2: memref<8x8xf32, #tpu.memory_space<vmem>>, %arg3: memref<32x40xf32, #tpu.memory_space<vmem>>, %arg4: memref<1x40xf32, #tpu.memory_space<vmem>>, %arg5: memref<40x40xf32, #tpu.memory_space<vmem>>, %arg6: memref<1x40xf32, #tpu.memory_space<vmem>>, %arg7: memref<40x8xf32, #tpu.memory_space<vmem>>, %arg8: memref<1x8xf32, #tpu.memory_space<vmem>>, %arg9: memref<1x8xf32, #tpu.memory_space<vmem>>) attributes {dimension_semantics = [#tpu.dimension_semantics<parallel>], iteration_bounds = array<i64: 1>, scalar_prefetch = 0 : i64, scratch_operands = 0 : i64, tpu.core_type = #tpu.core_type<tc>, window_params = [{transform_indices = @transform_0, window_bounds = array<i64: 8, 32>}, {transform_indices = @transform_1, window_bounds = array<i64: 8, 8>}, {pipeline_mode = #tpu.pipeline_mode<synchronous>, transform_indices = @transform_2, window_bounds = array<i64: 32, 40>}, {pipeline_mode = #tpu.pipeline_mode<synchronous>, transform_indices = @transform_3, window_bounds = array<i64: 1, 40>}, {pipeline_mode = #tpu.pipeline_mode<synchronous>, transform_indices = @transform_4, window_bounds = array<i64: 40, 40>}, {pipeline_mode = #tpu.pipeline_mode<synchronous>, transform_indices = @transform_5, window_bounds = array<i64: 1, 40>}, {pipeline_mode = #tpu.pipeline_mode<synchronous>, transform_indices = @transform_6, window_bounds = array<i64: 40, 8>}, {pipeline_mode = #tpu.pipeline_mode<synchronous>, transform_indices = @transform_7, window_bounds = array<i64: 1, 8>}, {transform_indices = @transform_8, window_bounds = array<i64: 1, 8>}]} {
    %c0 = arith.constant 0 : index
    %c0_0 = arith.constant 0 : index
    %0 = vector.load %arg1[%c0, %c0_0] : memref<8x32xf32, #tpu.memory_space<vmem>>, vector<8x32xf32>
    %c0_1 = arith.constant 0 : index
    %c0_2 = arith.constant 0 : index
    %1 = vector.load %arg3[%c0_1, %c0_2] : memref<32x40xf32, #tpu.memory_space<vmem>>, vector<32x40xf32>
    %cst = arith.constant dense<0.000000e+00> : vector<8x40xf32>
    %2 = tpu.matmul %0, %1, %cst {dimension_numbers = #tpu.dot_dimension_numbers<[1], [0], [0], [1], [0, 0, 1, 1], [], []>} : vector<8x32xf32>, vector<32x40xf32>, vector<8x40xf32> -> vector<8x40xf32>
    %c0_3 = arith.constant 0 : index
    %c0_4 = arith.constant 0 : index
    %3 = vector.load %arg4[%c0_3, %c0_4] : memref<1x40xf32, #tpu.memory_space<vmem>>, vector<1x40xf32>
    %4 = vector.broadcast %3 : vector<1x40xf32> to vector<8x40xf32>
    %5 = arith.addf %2, %4 : vector<8x40xf32>
    %cst_5 = arith.constant 0.000000e+00 : f32
    %6 = vector.broadcast %cst_5 : f32 to vector<8x40xf32>
    %7 = arith.maximumf %5, %6 : vector<8x40xf32>
    %c0_6 = arith.constant 0 : index
    %c0_7 = arith.constant 0 : index
    %8 = vector.load %arg5[%c0_6, %c0_7] : memref<40x40xf32, #tpu.memory_space<vmem>>, vector<40x40xf32>
    %cst_8 = arith.constant dense<0.000000e+00> : vector<8x40xf32>
    %9 = tpu.matmul %7, %8, %cst_8 {dimension_numbers = #tpu.dot_dimension_numbers<[1], [0], [0], [1], [0, 0, 1, 1], [], []>} : vector<8x40xf32>, vector<40x40xf32>, vector<8x40xf32> -> vector<8x40xf32>
    %c0_9 = arith.constant 0 : index
    %c0_10 = arith.constant 0 : index
    %10 = vector.load %arg6[%c0_9, %c0_10] : memref<1x40xf32, #tpu.memory_space<vmem>>, vector<1x40xf32>
    %11 = vector.broadcast %10 : vector<1x40xf32> to vector<8x40xf32>
    %12 = arith.addf %9, %11 : vector<8x40xf32>
    %cst_11 = arith.constant 0.000000e+00 : f32
    %13 = vector.broadcast %cst_11 : f32 to vector<8x40xf32>
    %14 = arith.maximumf %12, %13 : vector<8x40xf32>
    %c0_12 = arith.constant 0 : index
    %c0_13 = arith.constant 0 : index
    %15 = vector.load %arg7[%c0_12, %c0_13] : memref<40x8xf32, #tpu.memory_space<vmem>>, vector<40x8xf32>
    %cst_14 = arith.constant dense<0.000000e+00> : vector<8x8xf32>
    %16 = tpu.matmul %14, %15, %cst_14 {dimension_numbers = #tpu.dot_dimension_numbers<[1], [0], [0], [1], [0, 0, 1, 1], [], []>} : vector<8x40xf32>, vector<40x8xf32>, vector<8x8xf32> -> vector<8x8xf32>
    %c0_15 = arith.constant 0 : index
    %c0_16 = arith.constant 0 : index
    %17 = vector.load %arg8[%c0_15, %c0_16] : memref<1x8xf32, #tpu.memory_space<vmem>>, vector<1x8xf32>
    %18 = vector.broadcast %17 : vector<1x8xf32> to vector<8x8xf32>
    %19 = arith.addf %16, %18 : vector<8x8xf32>
    %c0_17 = arith.constant 0 : index
    %c0_18 = arith.constant 0 : index
    %20 = vector.load %arg2[%c0_17, %c0_18] : memref<8x8xf32, #tpu.memory_space<vmem>>, vector<8x8xf32>
    %cst_19 = arith.constant 2.000000e+00 : f32
    %21 = vector.broadcast %cst_19 : f32 to vector<8x8xf32>
    %22 = arith.mulf %21, %20 : vector<8x8xf32>
    %cst_20 = arith.constant 1.000000e+00 : f32
    %23 = vector.broadcast %cst_20 : f32 to vector<8x8xf32>
    %24 = arith.subf %22, %23 : vector<8x8xf32>
    %25 = arith.mulf %24, %19 : vector<8x8xf32>
    %cst_21 = arith.constant 0.000000e+00 : f32
    %26 = vector.broadcast %cst_21 : f32 to vector<8x8xf32>
    %27 = arith.minimumf %25, %26 : vector<8x8xf32>
    %28 = math.absf %25 : vector<8x8xf32>
    %cst_22 = arith.constant 0.000000e+00 : f32
    %29 = vector.broadcast %cst_22 : f32 to vector<8x8xf32>
    %30 = arith.subf %29, %28 : vector<8x8xf32>
    %31 = math.exp %30 : vector<8x8xf32>
    %cst_23 = arith.constant 1.000000e+00 : f32
    %32 = vector.broadcast %cst_23 : f32 to vector<8x8xf32>
    %33 = arith.addf %32, %31 : vector<8x8xf32>
    %34 = math.log %33 : vector<8x8xf32>
    %35 = arith.subf %27, %34 : vector<8x8xf32>
    %cst_24 = arith.constant dense<0.000000e+00> : vector<8xf32>
    %36 = vector.multi_reduction <add>, %35, %cst_24 [1] : vector<8x8xf32> to vector<8xf32>
    %37 = vector.shape_cast %36 : vector<8xf32> to vector<1x8xf32>
    %c0_25 = arith.constant 0 : index
    %c0_26 = arith.constant 0 : index
    %38 = vector.load %arg9[%c0_25, %c0_26] : memref<1x8xf32, #tpu.memory_space<vmem>>, vector<1x8xf32>
    tpu.vector_store %arg9[%c0_25, %c0_26], %37 {strides = array<i32>} : memref<1x8xf32, #tpu.memory_space<vmem>>, vector<1x8xf32>,
    return
  }
  func.func @transform_0(%arg0: i32) -> (i32, i32) {
    %c0_i32 = arith.constant 0 : i32
    %c0_i32_0 = arith.constant 0 : i32
    return %arg0, %c0_i32 : i32, i32
  }
  func.func @transform_1(%arg0: i32) -> (i32, i32) {
    %c0_i32 = arith.constant 0 : i32
    %c0_i32_0 = arith.constant 0 : i32
    return %arg0, %c0_i32 : i32, i32
  }
  func.func @transform_2(%arg0: i32) -> (i32, i32) {
    %c0_i32 = arith.constant 0 : i32
    %c0_i32_0 = arith.constant 0 : i32
    %c0_i32_1 = arith.constant 0 : i32
    return %c0_i32, %c0_i32_0 : i32, i32
  }
  func.func @transform_3(%arg0: i32) -> (i32, i32) {
    %c0_i32 = arith.constant 0 : i32
    %c0_i32_0 = arith.constant 0 : i32
    %c0_i32_1 = arith.constant 0 : i32
    return %c0_i32, %c0_i32_0 : i32, i32
  }
  func.func @transform_4(%arg0: i32) -> (i32, i32) {
    %c0_i32 = arith.constant 0 : i32
    %c0_i32_0 = arith.constant 0 : i32
    %c0_i32_1 = arith.constant 0 : i32
    return %c0_i32, %c0_i32_0 : i32, i32
  }
  func.func @transform_5(%arg0: i32) -> (i32, i32) {
    %c0_i32 = arith.constant 0 : i32
    %c0_i32_0 = arith.constant 0 : i32
    %c0_i32_1 = arith.constant 0 : i32
    return %c0_i32, %c0_i32_0 : i32, i32
  }
  func.func @transform_6(%arg0: i32) -> (i32, i32) {
    %c0_i32 = arith.constant 0 : i32
    %c0_i32_0 = arith.constant 0 : i32
    %c0_i32_1 = arith.constant 0 : i32
    return %c0_i32, %c0_i32_0 : i32, i32
  }
  func.func @transform_7(%arg0: i32) -> (i32, i32) {
    %c0_i32 = arith.constant 0 : i32
    %c0_i32_0 = arith.constant 0 : i32
    %c0_i32_1 = arith.constant 0 : i32
    return %c0_i32, %c0_i32_0 : i32, i32
  }
  func.func @transform_8(%arg0: i32) -> (i32, i32) {
    %c0_i32 = arith.constant 0 : i32
    %c0_i32_0 = arith.constant 0 : i32
    return %c0_i32, %arg0 : i32, i32
  }
}

</mosaic_0001>

<bundles_post_ra>
// kernel: tpu_custom_call.1
= control target key start
LH: loop header
LB: loop body
LE: loop exit
PB: predicated region body
PF: predicated region fallthrough
CT: control target
= control target key end

     0   :  { %13 = vsyncpa [#allocation3], 0  ;;  %s607_s0 = inlined_call_operand.vmem [shape: f32[8,32], index: 0, kind: input, shape index: {}]   ;;  %s608_s1 = inlined_call_operand.vmem [shape: f32[8,8], index: 1, kind: input, shape index: {}]   ;;  %s609_s2 = inlined_call_operand.hbm [shape: f32[32,40], index: 2, kind: input, shape index: {}]   ;;  %s610_s3 = inlined_call_operand.vmem [shape: f32[1,40], index: 3, kind: input, shape index: {}]   ;;  %s611_s4 = inlined_call_operand.vmem [shape: f32[40,40], index: 4, kind: input, shape index: {}]   ;;  %s612_s5 = inlined_call_operand.vmem [shape: f32[1,40], index: 5, kind: input, shape index: {}]   ;;  %s613_s6 = inlined_call_operand.vmem [shape: f32[40,8], index: 6, kind: input, shape index: {}]   ;;  %s614_s7 = inlined_call_operand.vmem [shape: f32[1,8], index: 7, kind: input, shape index: {}]   ;;  %s615_s8 = inlined_call_operand.hbm [shape: f32[1,8], index: 8, kind: output, shape index: {}]  }
   0x1   :  { %14 = vsyncpa [#allocation4], 0  ;;  %s483_s27 = smov [#allocation2]   ;;  %s435_s9 = scalar_lea.hbm %s609_s2, 512 }
   0x2   :  { %s24_s28 = sshll.u32 %s483_s27, 4  ;;  %p436_p0 = scmp.ne.s32.totalorder %s609_s2, %s435_s9  ;;  %s25_s28 = int_to_ptr.vmem [resolvable:$true] %s24_s28 }
   0x3   :  { %p439_p1 = scmp.lt.u32.totalorder %s435_s9, %s609_s2 }
   0x5   :  { %p441_p2 = pnand %p439_p1, %p436_p0 }
   0x7   :  { %444 = shalt.err (!%p441_p2)
}
   0x8   :  { %s445_s14 = scalar_lea.vmem %s25_s28, 512  ;;  %p450_p4 = scmp.lt.s32.totalorder %s25_s28, %s25_s28 }
   0x9   :  { %p446_p3 = scmp.ne.s32.totalorder %s25_s28, %s445_s14  ;;  %p451_p5 = scmp.lt.s32.totalorder %s445_s14, %s445_s14 }
   0xb   :  { %p452_p6 = por %p451_p5, %p450_p4 }
   0xd   :  { %p453_p7 = pnand %p452_p6, %p446_p3 }
   0xf   :  { %456 = shalt.err (!%p453_p7)
}
  0x10   :  { %s484_s15 = smov 128   ;;  %s485_s16 = smov 8  }
  0x11   :  { %30 = dma.hbm_to_vmem [thread:$0]  %s609_s2, 512, %s25_s28, [#allocation3], %s484_s15, %s484_s15, %s485_s16  }
  0x12   :  { %479 = dma.done.wait [#allocation3], 512  }
  0x13   :  { %480 = vsyncadd [#allocation3], 4294966784  ;;  %v486_v0 = vmov 0.0|0.0   ;;  %vm487_vm0 = vmmov 0   ;;  %v488_v1 = vmov 0.0   ;;  %v45_v2 = vld [vmem:[#allocation2] sm:$0xff]  ;;  %v321_v51 = vlaneseq }
  0x14   :  { %406 = vmatprep.subr.bf16.mxu0 %v486_v0  ;;  %377 = vmatprep.mubr.msk.f32.mxu0 %vm487_vm0, %v488_v1  ;;  %v46_v3 = vld [vmem:[#allocation2 + $0x8] sm:$0xff]  ;;  %v47_v4 = vld [vmem:[#allocation2 + $0x10] sm:$0xff]  ;;  %v48_v6 = vld [vmem:[#allocation2 + $0x18] sm:$0xff]  ;;  %vm56_vm1 = vcmask 261120   ;;  %vm143_vm2 = vcmask 326656   ;;  %vm316_vm3 = vcmask 64512  }
  0x15   :  { %412 = vmatprep.subr.bf16.mxu1 %v486_v0  ;;  %390 = vmatprep.mubr.msk.f32.mxu1 %vm487_vm0, %v488_v1  ;;  %v407_v5 = vpack.c.bf16 %v46_v3, %v45_v2  ;;  %v131_v7 = vld [vmem:[%s611_s4] sm:$0xff]  ;;  %v132_v8 = vld [vmem:[%s611_s4 + $0x8] sm:$0xff]  ;;  %v410_v9 = vpack.c.bf16 %v48_v6, %v47_v4  ;;  %v133_v12 = vld [vmem:[%s611_s4 + $0x10] sm:$0xff]  ;;  %v322_v52 = vand.u32 127, %v321_v51  ;;  %v324_v53 = vshrl.u32 %v321_v51, 7 }
  0x16   :  { %v413_v10 = vpack.c.bf16 %v132_v8, %v131_v7  ;;  %v44_v11 = vld [vmem:[%s607_s0] sm:$0xff]  ;;  %v134_v13 = vld [vmem:[%s611_s4 + $0x18] sm:$0xff]  ;;  %v219_v17 = vld [vmem:[%s613_s6 + $0x8] sm:$0xff]  ;;  %vm328_vm4 = vcmask 57344  }
  0x17   :  { %408 = vmatpush3.bf16.msra.mxu0 %v407_v5  ;;  %v416_v14 = vpack.c.bf16 %v134_v13, %v133_v12  ;;  %v135_v15 = vld [vmem:[%s611_s4 + $0x20] sm:$0xff]  ;;  %v220_v24 = vld [vmem:[%s613_s6 + $0x10] sm:$0xff]  ;;  %v221_v25 = vld [vmem:[%s613_s6 + $0x18] sm:$0xff]  ;;  %v325_v54 = vsub.s32 %v322_v52, %v324_v53 }
  0x18   :  { %409 = vmatprep.subr.bf16.mxu0 %v486_v0  ;;  %414 = vmatpush3.bf16.msra.mxu1 %v413_v10  ;;  %v218_v16 = vld [vmem:[%s613_s6] sm:$0xff]  ;;  %v422_v26 = vpack.c.bf16 %v221_v25, %v220_v24 }
  0x19   :  { %415 = vmatprep.subr.bf16.mxu1 %v486_v0  ;;  %v419_v18 = vpack.c.bf16 %v219_v17, %v218_v16  ;;  %v345_v19 = vld [vmem:[%s610_s3] ss:$0 sm:$0xff] }
  0x1a   :  { %v222_v27 = vld [vmem:[%s613_s6 + $0x20] sm:$0xff] }
  0x1b   :  { %411 = vmatpush3.bf16.msra.mxu0 %v410_v9  ;;  %v347_v28 = vld [vmem:[%s612_s5] ss:$0 sm:$0xff] }
  0x1c   :  { %418 = vmatprep.subr.bf16.mxu0 %v486_v0  ;;  %417 = vmatpush3.bf16.msra.mxu1 %v416_v14  ;;  %v303_v33 = vld [vmem:[%s608_s1] sm:$0xff]  ;;  %s489_s1 = smov [#allocation5]  }
  0x1d   :  { %388 = vmatprep.subr.mxu1 %v488_v1  ;;  %v304_v34 = vmul.f32 2.0, %v303_v33  ;;  %v349_v35 = vld [vmem:[%s614_s7] ss:$0 sm:$0xff]  ;;  %s336_s5 = sshll.u32 %s489_s1, 4  ;;  %s337_s5 = int_to_ptr.vmem [resolvable:$true] %s336_s5 }
  0x1e   :  { %378 = vmatmul.mubr.msk.f32.vlgmr.msra.gmra.mrb[0].mxu0 %vm56_vm1, %v44_v11  ;;  %s457_s6 = scalar_lea.vmem %s337_s5, 16  ;;  %s461_s7 = scalar_lea.vmem %s337_s5, 32 }
  0x1f   :  { %403 = vmatprep.mubr.msk.f32.mxu0 %vm487_vm0, %v488_v1  ;;  %420 = vmatpush3.bf16.msra.mxu0 %v419_v18  ;;  %v351_v36 = vadd.f32 -1.0, %v304_v34  ;;  %p458_p8 = scmp.ne.s32.totalorder %s337_s5, %s457_s6  ;;  %p462_p9 = scmp.lt.s32.totalorder %s337_s5, %s337_s5 }
  0x20   :  { %389 = vmatpush3.msra.mxu1 %v135_v15  ;;  %421 = vmatprep.subr.bf16.mxu0 %v486_v0  ;;  %p463_p10 = scmp.lt.s32.totalorder %s461_s7, %s457_s6 }
  0x22   :  { %p464_p11 = por %p463_p10, %p462_p9 }
  0x23   :  { %423 = vmatpush3.bf16.msra.mxu0 %v422_v26 }
  0x24   :  { %401 = vmatprep.subr.mxu0 %v488_v1  ;;  %p465_p12 = pnand %p464_p11, %p458_p8 }
  0x27   :  { %402 = vmatpush3.msra.mxu0 %v222_v27 }
  0xf1   :  { %v126_v20 = vpop.f32.mrb[0].mxu0 }
  0xf2   :  { %v127_v21 = vadd.f32 %v345_v19, %v126_v20  ;;  %v379_v22 = vpop.f32.mrb[1].mxu0 }
  0xf4   :  { %v130_v23 = vmax.f32 %v127_v21, 0.0 }
  0xf6   :  { %391 = vmatmul.mubr.msk.f32.vlgmr.msra.gmra.mrb[0].mxu1 %vm143_vm2, %v130_v23 }
 0x1c9   :  { %v213_v29 = vpop.f32.mrb[0].mxu1 }
 0x1ca   :  { %v214_v30 = vadd.f32 %v347_v28, %v213_v29  ;;  %v392_v31 = vpop.f32.mrb[1].mxu1 }
 0x1cc   :  { %v217_v32 = vmax.f32 %v214_v30, 0.0 }
 0x1ce   :  { %404 = vmatmul.mubr.msk.f32.vlgmr.msra.gmra.mrb[2].mxu0 %vm143_vm2, %v217_v32 }
 0x2a1   :  { %v299_v37 = vpop.f32.mrb[2].mxu0 }
 0x2a2   :  { %v300_v38 = vadd.f32 %v349_v35, %v299_v37  ;;  %v405_v39 = vpop.f32.mrb[3].mxu0 }
 0x2a4   :  { %v306_v40 = vmul.f32 %v351_v36, %v300_v38 }
 0x2a6   :  { %v308_v41 = vand.u32 2147483647, %v306_v40  ;;  %v307_v47 = vmin.f32 %v306_v40, 0.0 }
 0x2a8   :  { %v309_v42 = vsub.f32 0.0, %v308_v41 }
 0x2aa   :  { %v310_v43 = vmul.f32 1.442695, %v309_v42 }
 0x2ac   :  { %431 = vpow2.f32 %v310_v43 }
 0x2b6   :  { %v432_v44 = vpop.eup %431 }
 0x2b7   :  { %v312_v45 = vadd.f32 1.0, %v432_v44 }
 0x2b9   :  { %433 = vlog2.f32 %v312_v45 }
 0x2c3   :  { %v434_v46 = vpop.eup %433 }
 0x2c4   :  { %v314_v48 = vmul.f32 0.6931472, %v434_v46 }
 0x2c6   :  { %v315_v49 = vsub.f32 %v307_v47, %v314_v48 }
 0x2c8   :  { %v317_v50 = vsel %vm316_vm3, %v315_v49, 0.0 }
 0x2c9   :  { %318 = vadd.xlane.f32.xlu0 %v317_v50 }
 0x356   :  { %v319_v55 = vpop.xlane.xlu0 %318 }
 0x357   :  { %v326_v56 = vrot.slane %v319_v55, %v325_v54 }
 0x359   :  { %329 = vst.msk [vmem:[#allocation5] sm:$0x1] %vm328_vm4, %v326_v56 }
 0x35a   :  { %468 = shalt.err (!%p465_p12)
}
 0x35b   :  { %s469_s24 = scalar_lea.hbm %s615_s8, 16 }
 0x35c   :  { %p470_p13 = scmp.ne.s32.totalorder %s615_s8, %s469_s24  ;;  %p473_p0 = scmp.lt.u32.totalorder %s469_s24, %s615_s8 }
 0x35e   :  { %p475_p1 = pnand %p473_p0, %p470_p13 }
 0x360   :  { %478 = shalt.err (!%p475_p1)
}
 0x361   :  { %339 = dma.vmem_to_hbm [thread:$0]  %s337_s5, 16, %s615_s8, [#allocation4]  }
 0x362   :  { %481 = dma.done.wait [#allocation4], 16  }
 0x363   :  { %482 = vsyncadd [#allocation4], 4294967280 }
 0x364   :  { %343 = vsyncpa [#allocation3], 1 }
 0x365   :  { %344 = vsyncpa [#allocation4], 1 }

</bundles_post_ra>
